<compile_context>
chip_gen: v6e
topology: v6e:2x2x1
jax: 0.10.0
libtpu: 0.0.40
codegen_flags: <defaults>
</compile_context>

<pallas_src>
import functools

import jax
import jax.numpy as jnp
from jax.experimental import pallas as pl
from jax.experimental.pallas import tpu as pltpu

LANE = 128            # lane width (last-dim granule)
SINGLE_STEP_MAX_B = 2048   # up to this many (aligned) rows -> grid=(1,)
MAX_TILE_B = 4096          # tile cap for large-batch eval (VMEM budget, v7x-safe)


def _round_up(n, m):
    return (n + m - 1) // m * m


# ----------------------------------------------------------------------------- kernel ---

def qnet_kernel(x_ref, w1_ref, b1_ref, w2_ref, b2_ref, w3_ref, b3_ref, o_ref):
    """One batch tile: [TB, in] -> [TB, 128] -> [TB, 128] -> [TB, 128]."""
    # Cast x to the (possibly bf16) weight dtype in-kernel; MXU accumulates in f32.
    x = x_ref[...].astype(w1_ref.dtype)

    # Layer 1: Linear + ReLU (epilogue stays f32).
    h1 = jnp.dot(x, w1_ref[...], preferred_element_type=jnp.float32)
    h1 = jnp.maximum(h1 + b1_ref[...], 0.0)

    # Layer 2: Linear + ReLU (K = N = 128, lane-dense).
    h2 = jnp.dot(h1.astype(w2_ref.dtype), w2_ref[...],
                 preferred_element_type=jnp.float32)
    h2 = jnp.maximum(h2 + b2_ref[...], 0.0)

    # Layer 3: Linear (Q head padded to 128 lanes -> unmasked, lane-dense store).
    q = jnp.dot(h2.astype(w3_ref.dtype), w3_ref[...],
                preferred_element_type=jnp.float32) + b3_ref[...]
    o_ref[...] = q.astype(o_ref.dtype)


# ------------------------------------------------------------------ one-time param prep ---

def prepare_params(raw, *, use_bf16=True):
    """One-time parameter preprocessing (do NOT call per forward):
       * zero-pad hidden 64 -> 128 and output -> 128 lanes (math stays exact:
         ReLU(0 + 0) = 0 contributes nothing),
       * optionally cast weights to bf16 once (biases stay f32)."""
    w1, b1, w2, b2, w3, b3 = (raw["w1"], raw["b1"], raw["w2"],
                              raw["b2"], raw["w3"], raw["b3"])
    hid = w1.shape[1]
    out_dim = w3.shape[1]
    hp = _round_up(max(hid, LANE), LANE)       # 64  -> 128
    op = _round_up(max(out_dim, LANE), LANE)   # 2   -> 128

    w1p = jnp.pad(w1, ((0, 0), (0, hp - hid)))
    b1p = jnp.pad(b1, ((0, 0), (0, hp - hid)))
    w2p = jnp.pad(w2, ((0, hp - hid), (0, hp - hid)))
    b2p = jnp.pad(b2, ((0, 0), (0, hp - hid)))
    w3p = jnp.pad(w3, ((0, hp - hid), (0, op - out_dim)))
    b3p = jnp.pad(b3, ((0, 0), (0, op - out_dim)))

    wdt = jnp.bfloat16 if use_bf16 else w1.dtype   # bf16 is full-rate on v5e/v6e/v7x MXU
    return {"w1": w1p.astype(wdt), "b1": b1p,
            "w2": w2p.astype(wdt), "b2": b2p,
            "w3": w3p.astype(wdt), "b3": b3p}


# --------------------------------------------------------------------------- forward ---

@functools.partial(jax.jit, static_argnames=("out_dim", "block_b", "slice_output"))
def qnetwork_forward(x, prepped, *, out_dim, block_b=None, slice_output=True):
    """x: [B, input_dim] float32. prepped: output of prepare_params.

    Returns Q-values [B, out_dim] f32 (or the padded [b_pad, 128] buffer if
    slice_output=False, so downstream consumers avoid an extra HBM pass)."""
    w1, b1, w2, b2, w3, b3 = (prepped["w1"], prepped["b1"], prepped["w2"],
                              prepped["b2"], prepped["w3"], prepped["b3"])
    B, in_dim = x.shape
    out_pad = w3.shape[1]

    # bf16 packs 16 rows per sublane group; f32 packs 8.
    row_align = 16 if w1.dtype == jnp.bfloat16 else 8

    if block_b is None:
        b_aligned = _round_up(B, row_align)
        if b_aligned <= SINGLE_STEP_MAX_B:
            # Overhead-bound regime: one grid step (each step costs ~0.35 us).
            block_b = b_aligned
        else:
            # Large-batch eval: >=2 steps so v7x's 2 TCs both get work; cap the tile
            # so the double-buffered f32 [block_b, 128] output fits scoped VMEM.
            n_steps = max(2, pl.cdiv(b_aligned, MAX_TILE_B))
            block_b = _round_up(pl.cdiv(b_aligned, n_steps), row_align)
    block_b = _round_up(block_b, row_align)

    b_pad = _round_up(max(B, block_b), block_b)
    if b_pad != B:
        x = jnp.pad(x, ((0, b_pad - B), (0, 0)))

    grid = (b_pad // block_b,)
    const = lambda shape: pl.BlockSpec(shape, lambda i: (0, 0))  # VMEM-resident params

    out = pl.pallas_call(
        qnet_kernel,
        out_shape=jax.ShapeDtypeStruct((b_pad, out_pad), jnp.float32),
        grid=grid,
        in_specs=[
            pl.BlockSpec((block_b, in_dim), lambda i: (i, 0)),   # activations: batch-tiled
            const(w1.shape), const(b1.shape),
            const(w2.shape), const(b2.shape),
            const(w3.shape), const(b3.shape),
        ],
        out_specs=pl.BlockSpec((block_b, out_pad), lambda i: (i, 0)),
        compiler_params=pltpu.CompilerParams(
            dimension_semantics=("parallel",)),  # batch axis shards across TCs on v7x
    )(x, w1, b1, w2, b2, w3, b3)

    if slice_output:
        return out[:B, :out_dim]
    # NOTE: rows >= B and lanes >= out_dim are padding (rows hold Q = bias); do not
    # consume the padded buffer without masking / slicing lanes [:out_dim].
    return out


# ------------------------------------------------------------------------ init + ref ---

def init_params(key, input_dim, output_dim, hidden_dim=64):
    """Deterministic init mirroring PyTorch nn.Linear default:
    U(-1/sqrt(fan_in), 1/sqrt(fan_in)) for both weight and bias."""
    def linear(k, fan_in, fan_out):
        kw, kb = jax.random.split(k)
        bound = 1.0 / jnp.sqrt(jnp.float32(fan_in))
        # stored as [in, out] = PyTorch weight.T
        w = jax.random.uniform(kw, (fan_in, fan_out), jnp.float32, -bound, bound)
        b = jax.random.uniform(kb, (1, fan_out), jnp.float32, -bound, bound)
        return w, b

    k1, k2, k3 = jax.random.split(key, 3)
    w1, b1 = linear(k1, input_dim, hidden_dim)
    w2, b2 = linear(k2, hidden_dim, hidden_dim)
    w3, b3 = linear(k3, hidden_dim, output_dim)
    return {"w1": w1, "b1": b1, "w2": w2, "b2": b2, "w3": w3, "b3": b3}


def qnetwork_ref(x, p):
    h1 = jnp.maximum(x @ p["w1"] + p["b1"], 0.0)
    h2 = jnp.maximum(h1 @ p["w2"] + p["b2"], 0.0)
    return h2 @ p["w3"] + p["b3"]


if __name__ == "__main__":
    # Observation from StocksEnv with window_size=10 and 2 signal features, flattened
    # -> input_dim = 20; action space (Buy/Sell) -> output_dim = 2.
    batch, input_dim, output_dim, hidden_dim = 256, 20, 2, 64

    key = jax.random.PRNGKey(0)
    kx, kp = jax.random.split(key)
    x = jax.random.normal(kx, (batch, input_dim), jnp.float32)
    params = init_params(kp, input_dim, output_dim, hidden_dim)
    q_ref = qnetwork_ref(x, params)

    # --- f32 path (exact). B=256 -> single grid step. Params prepped ONCE. ---
    p32 = prepare_params(params, use_bf16=False)
    q = jax.block_until_ready(qnetwork_forward(x, p32, out_dim=output_dim))
    assert q.shape == (batch, output_dim)
    assert jnp.allclose(q, q_ref, atol=1e-4, rtol=1e-4)

    # --- bf16 weights (pre-cast once; valid on v5e/v6e/v7x), f32 accumulation. ---
    pbf = prepare_params(params, use_bf16=True)
    q_bf16 = jax.block_until_ready(qnetwork_forward(x, pbf, out_dim=output_dim))
    assert q_bf16.shape == (batch, output_dim)
    assert jnp.allclose(q_bf16, q_ref, atol=7.5e-2, rtol=7.5e-2)

    # --- large-batch eval path: exercises the >=2-step grid (both v7x TCs). ---
    x_big = jax.random.normal(kx, (2560, input_dim), jnp.float32)
    q_big = jax.block_until_ready(qnetwork_forward(x_big, p32, out_dim=output_dim))
    assert q_big.shape == (2560, output_dim)
    assert jnp.allclose(q_big, qnetwork_ref(x_big, params), atol=1e-4, rtol=1e-4)

    # TODO(synk): optionally fuse the DQN action-selection argmax into the kernel tail so
    # the padded Q buffer never needs to be sliced or re-read from HBM.
    print("KERNEL_OK")
</pallas_src>

<mosaic_0001>
module attributes {stable_mosaic.version = 11 : i64} {
  func.func @qnet_kernel(%arg0: i32, %arg1: memref<256x20xf32, #tpu.memory_space<vmem>>, %arg2: memref<20x128xf32, #tpu.memory_space<vmem>>, %arg3: memref<1x128xf32, #tpu.memory_space<vmem>>, %arg4: memref<128x128xf32, #tpu.memory_space<vmem>>, %arg5: memref<1x128xf32, #tpu.memory_space<vmem>>, %arg6: memref<128x128xf32, #tpu.memory_space<vmem>>, %arg7: memref<1x128xf32, #tpu.memory_space<vmem>>, %arg8: memref<256x128xf32, #tpu.memory_space<vmem>>) attributes {dimension_semantics = [#tpu.dimension_semantics<parallel>], iteration_bounds = array<i64: 1>, scalar_prefetch = 0 : i64, scratch_operands = 0 : i64, tpu.core_type = #tpu.core_type<tc>, window_params = [{transform_indices = @transform_0, window_bounds = array<i64: 256, 20>}, {pipeline_mode = #tpu.pipeline_mode<synchronous>, transform_indices = @transform_1, window_bounds = array<i64: 20, 128>}, {pipeline_mode = #tpu.pipeline_mode<synchronous>, transform_indices = @transform_2, window_bounds = array<i64: 1, 128>}, {pipeline_mode = #tpu.pipeline_mode<synchronous>, transform_indices = @transform_3, window_bounds = array<i64: 128, 128>}, {pipeline_mode = #tpu.pipeline_mode<synchronous>, transform_indices = @transform_4, window_bounds = array<i64: 1, 128>}, {pipeline_mode = #tpu.pipeline_mode<synchronous>, transform_indices = @transform_5, window_bounds = array<i64: 128, 128>}, {pipeline_mode = #tpu.pipeline_mode<synchronous>, transform_indices = @transform_6, window_bounds = array<i64: 1, 128>}, {transform_indices = @transform_7, window_bounds = array<i64: 256, 128>}]} {
    %c0 = arith.constant 0 : index
    %c0_0 = arith.constant 0 : index
    %0 = vector.load %arg1[%c0, %c0_0] : memref<256x20xf32, #tpu.memory_space<vmem>>, vector<256x20xf32>
    %c0_1 = arith.constant 0 : index
    %c0_2 = arith.constant 0 : index
    %1 = vector.load %arg2[%c0_1, %c0_2] : memref<20x128xf32, #tpu.memory_space<vmem>>, vector<20x128xf32>
    %cst = arith.constant dense<0.000000e+00> : vector<256x128xf32>
    %2 = tpu.matmul %0, %1, %cst {dimension_numbers = #tpu.dot_dimension_numbers<[1], [0], [0], [1], [0, 0, 1, 1], [], []>} : vector<256x20xf32>, vector<20x128xf32>, vector<256x128xf32> -> vector<256x128xf32>
    %c0_3 = arith.constant 0 : index
    %c0_4 = arith.constant 0 : index
    %3 = vector.load %arg3[%c0_3, %c0_4] : memref<1x128xf32, #tpu.memory_space<vmem>>, vector<1x128xf32>
    %4 = vector.broadcast %3 : vector<1x128xf32> to vector<256x128xf32>
    %5 = arith.addf %2, %4 : vector<256x128xf32>
    %cst_5 = arith.constant 0.000000e+00 : f32
    %6 = vector.broadcast %cst_5 : f32 to vector<256x128xf32>
    %7 = arith.maximumf %5, %6 : vector<256x128xf32>
    %c0_6 = arith.constant 0 : index
    %c0_7 = arith.constant 0 : index
    %8 = vector.load %arg4[%c0_6, %c0_7] : memref<128x128xf32, #tpu.memory_space<vmem>>, vector<128x128xf32>
    %cst_8 = arith.constant dense<0.000000e+00> : vector<256x128xf32>
    %9 = tpu.matmul %7, %8, %cst_8 {dimension_numbers = #tpu.dot_dimension_numbers<[1], [0], [0], [1], [0, 0, 1, 1], [], []>} : vector<256x128xf32>, vector<128x128xf32>, vector<256x128xf32> -> vector<256x128xf32>
    %c0_9 = arith.constant 0 : index
    %c0_10 = arith.constant 0 : index
    %10 = vector.load %arg5[%c0_9, %c0_10] : memref<1x128xf32, #tpu.memory_space<vmem>>, vector<1x128xf32>
    %11 = vector.broadcast %10 : vector<1x128xf32> to vector<256x128xf32>
    %12 = arith.addf %9, %11 : vector<256x128xf32>
    %cst_11 = arith.constant 0.000000e+00 : f32
    %13 = vector.broadcast %cst_11 : f32 to vector<256x128xf32>
    %14 = arith.maximumf %12, %13 : vector<256x128xf32>
    %c0_12 = arith.constant 0 : index
    %c0_13 = arith.constant 0 : index
    %15 = vector.load %arg6[%c0_12, %c0_13] : memref<128x128xf32, #tpu.memory_space<vmem>>, vector<128x128xf32>
    %cst_14 = arith.constant dense<0.000000e+00> : vector<256x128xf32>
    %16 = tpu.matmul %14, %15, %cst_14 {dimension_numbers = #tpu.dot_dimension_numbers<[1], [0], [0], [1], [0, 0, 1, 1], [], []>} : vector<256x128xf32>, vector<128x128xf32>, vector<256x128xf32> -> vector<256x128xf32>
    %c0_15 = arith.constant 0 : index
    %c0_16 = arith.constant 0 : index
    %17 = vector.load %arg7[%c0_15, %c0_16] : memref<1x128xf32, #tpu.memory_space<vmem>>, vector<1x128xf32>
    %18 = vector.broadcast %17 : vector<1x128xf32> to vector<256x128xf32>
    %19 = arith.addf %16, %18 : vector<256x128xf32>
    %c0_17 = arith.constant 0 : index
    %c0_18 = arith.constant 0 : index
    %20 = vector.load %arg8[%c0_17, %c0_18] : memref<256x128xf32, #tpu.memory_space<vmem>>, vector<256x128xf32>
    tpu.vector_store %arg8[%c0_17, %c0_18], %19 {strides = array<i32>} : memref<256x128xf32, #tpu.memory_space<vmem>>, vector<256x128xf32>,
    return
  }
  func.func @transform_0(%arg0: i32) -> (i32, i32) {
    %c0_i32 = arith.constant 0 : i32
    %c0_i32_0 = arith.constant 0 : i32
    return %arg0, %c0_i32 : i32, i32
  }
  func.func @transform_1(%arg0: i32) -> (i32, i32) {
    %c0_i32 = arith.constant 0 : i32
    %c0_i32_0 = arith.constant 0 : i32
    %c0_i32_1 = arith.constant 0 : i32
    return %c0_i32, %c0_i32_0 : i32, i32
  }
  func.func @transform_2(%arg0: i32) -> (i32, i32) {
    %c0_i32 = arith.constant 0 : i32
    %c0_i32_0 = arith.constant 0 : i32
    %c0_i32_1 = arith.constant 0 : i32
    return %c0_i32, %c0_i32_0 : i32, i32
  }
  func.func @transform_3(%arg0: i32) -> (i32, i32) {
    %c0_i32 = arith.constant 0 : i32
    %c0_i32_0 = arith.constant 0 : i32
    %c0_i32_1 = arith.constant 0 : i32
    return %c0_i32, %c0_i32_0 : i32, i32
  }
  func.func @transform_4(%arg0: i32) -> (i32, i32) {
    %c0_i32 = arith.constant 0 : i32
    %c0_i32_0 = arith.constant 0 : i32
    %c0_i32_1 = arith.constant 0 : i32
    return %c0_i32, %c0_i32_0 : i32, i32
  }
  func.func @transform_5(%arg0: i32) -> (i32, i32) {
    %c0_i32 = arith.constant 0 : i32
    %c0_i32_0 = arith.constant 0 : i32
    %c0_i32_1 = arith.constant 0 : i32
    return %c0_i32, %c0_i32_0 : i32, i32
  }
  func.func @transform_6(%arg0: i32) -> (i32, i32) {
    %c0_i32 = arith.constant 0 : i32
    %c0_i32_0 = arith.constant 0 : i32
    %c0_i32_1 = arith.constant 0 : i32
    return %c0_i32, %c0_i32_0 : i32, i32
  }
  func.func @transform_7(%arg0: i32) -> (i32, i32) {
    %c0_i32 = arith.constant 0 : i32
    %c0_i32_0 = arith.constant 0 : i32
    return %arg0, %c0_i32 : i32, i32
  }
}

</mosaic_0001>

<bundles_post_ra>
// kernel: qnetwork_forward.1
= control target key start
LH: loop header
LB: loop body
LE: loop exit
PB: predicated region body
PF: predicated region fallthrough
CT: control target
= control target key end

     0   :  { %vm165_vm0 = vcmask 1043456   ;;  %vm68_vm1 = vcmask 162816   ;;  %s1866_s1 = inlined_call_operand.vmem [shape: f32[20,128], index: 1, kind: input, shape index: {}]   ;;  %s1867_s0 = inlined_call_operand.vmem [shape: f32[256,20], index: 0, kind: input, shape index: {}]   ;;  %s1868_s3 = inlined_call_operand.vmem [shape: f32[128,128], index: 3, kind: input, shape index: {}]   ;;  %s1869_s5 = inlined_call_operand.vmem [shape: f32[128,128], index: 5, kind: input, shape index: {}]   ;;  %s1870_s2 = inlined_call_operand.vmem [shape: f32[1,128], index: 2, kind: input, shape index: {}]   ;;  %s1871_s4 = inlined_call_operand.vmem [shape: f32[1,128], index: 4, kind: input, shape index: {}]   ;;  %s1872_s6 = inlined_call_operand.vmem [shape: f32[1,128], index: 6, kind: input, shape index: {}]   ;;  %s1873_s7 = inlined_call_operand.vmem [shape: f32[256,128], index: 7, kind: output, shape index: {}]  }
   0x1   :  { %v60_v0 = vld [vmem:[%s1866_s1 + $0x10] sm:$0xf]  ;;  %v59_v1 = vld [vmem:[%s1866_s1 + $0x8] sm:$0xff]  ;;  %v26_v2 = vld [vmem:[%s1867_s0] sm:$0xff] }
   0x2   :  { %1157 = vmatprep.subr.msk.mxu0 %vm165_vm0, %v60_v0  ;;  %1371 = vmatprep.subr.msk.mxu1 %vm165_vm0, %v60_v0  ;;  %v58_v3 = vld [vmem:[%s1866_s1] sm:$0xff]  ;;  %v27_v4 = vld [vmem:[%s1867_s0 + $0x8] sm:$0xff]  ;;  %v28_v5 = vld [vmem:[%s1867_s0 + $0x10] sm:$0xff] }
   0x3   :  { %1158 = vmatpush3.msk.msra.mxu0 %vm165_vm0, %v60_v0  ;;  %1163 = vmatprep.mubr.msk.f32.mxu0 %vm68_vm1, %v26_v2  ;;  %v42_v6 = vld [vmem:[%s1867_s0 + $0x80] sm:$0xff]  ;;  %v43_v7 = vld [vmem:[%s1867_s0 + $0x88] sm:$0xff]  ;;  %v44_v8 = vld [vmem:[%s1867_s0 + $0x90] sm:$0xff] }
   0x4   :  { %1159 = vmatprep.subr.mxu0 %v59_v1  ;;  %1374 = vmatpush3.msk.msra.mxu1 %vm165_vm0, %v60_v0  ;;  %v29_v9 = vld [vmem:[%s1867_s0 + $0x18] sm:$0xff]  ;;  %v30_v10 = vld [vmem:[%s1867_s0 + $0x20] sm:$0xff]  ;;  %v31_v14 = vld [vmem:[%s1867_s0 + $0x28] sm:$0xff] }
   0x5   :  { %1160 = vmatpush3.msra.mxu0 %v59_v1  ;;  %1372 = vmatprep.subr.mxu1 %v59_v1  ;;  %v45_v11 = vld [vmem:[%s1867_s0 + $0x98] sm:$0xff]  ;;  %v46_v12 = vld [vmem:[%s1867_s0 + $0xa0] sm:$0xff]  ;;  %v440_v15 = vld [vmem:[%s1868_s3 + $0x70] sm:$0xff] }
   0x6   :  { %1161 = vmatprep.subr.mxu0 %v58_v3  ;;  %1375 = vmatpush3.msra.mxu1 %v59_v1  ;;  %v441_v13 = vld [vmem:[%s1868_s3 + $0x78] sm:$0xff]  ;;  %v32_v16 = vld [vmem:[%s1867_s0 + $0x30] sm:$0xff]  ;;  %v47_v17 = vld [vmem:[%s1867_s0 + $0xa8] sm:$0xff] }
   0x7   :  { %1162 = vmatpush3.msra.mxu0 %v58_v3  ;;  %1373 = vmatprep.subr.mxu1 %v58_v3  ;;  %v439_v18 = vld [vmem:[%s1868_s3 + $0x68] sm:$0xff]  ;;  %v48_v19 = vld [vmem:[%s1867_s0 + $0xb0] sm:$0xff]  ;;  %v33_v20 = vld [vmem:[%s1867_s0 + $0x38] sm:$0xff] }
   0x8   :  { %1164 = vmatmul.mubr.msk.f32.vlgmr.msra.gmra.mxu0 %vm68_vm1, %v27_v4  ;;  %1376 = vmatpush3.msra.mxu1 %v58_v3  ;;  %v438_v21 = vld [vmem:[%s1868_s3 + $0x60] sm:$0xff]  ;;  %v49_v23 = vld [vmem:[%s1867_s0 + $0xb8] sm:$0xff]  ;;  %v35_v26 = vld [vmem:[%s1867_s0 + $0x48] sm:$0xff] }
   0x9   :  { %1166 = vmatprep.mubr.msk.f32.mxu0 %vm68_vm1, %v28_v5  ;;  %1187 = vmatprep.mubr.msk.f32.mxu1 %vm68_vm1, %v42_v6  ;;  %v34_v22 = vld [vmem:[%s1867_s0 + $0x40] sm:$0xff]  ;;  %v437_v24 = vld [vmem:[%s1868_s3 + $0x58] sm:$0xff]  ;;  %v436_v27 = vld [vmem:[%s1868_s3 + $0x50] sm:$0xff] }
   0xa   :  { %1188 = vmatmul.mubr.msk.f32.vlgmr.msra.gmra.mxu1 %vm68_vm1, %v43_v7  ;;  %1211 = vmatprep.subr.mxu1 %v441_v13  ;;  %v50_v25 = vld [vmem:[%s1867_s0 + $0xc0] sm:$0xff]  ;;  %v36_v28 = vld [vmem:[%s1867_s0 + $0x50] sm:$0xff]  ;;  %v51_v29 = vld [vmem:[%s1867_s0 + $0xc8] sm:$0xff] }
   0xb   :  { %1190 = vmatprep.mubr.msk.f32.mxu1 %vm68_vm1, %v44_v8  ;;  %1212 = vmatpush3.msra.mxu1 %v441_v13  ;;  %v435_v30 = vld [vmem:[%s1868_s3 + $0x48] sm:$0xff]  ;;  %v52_v31 = vld [vmem:[%s1867_s0 + $0xd0] sm:$0xff]  ;;  %v37_v32 = vld [vmem:[%s1867_s0 + $0x58] sm:$0xff] }
   0xc   :  { %1167 = vmatmul.mubr.msk.f32.gmra.mxu0 %vm68_vm1, %v29_v9  ;;  %1213 = vmatprep.subr.mxu1 %v440_v15  ;;  %v434_v33 = vld [vmem:[%s1868_s3 + $0x40] sm:$0xff]  ;;  %v53_v35 = vld [vmem:[%s1867_s0 + $0xd8] sm:$0xff]  ;;  %v39_v38 = vld [vmem:[%s1867_s0 + $0x68] sm:$0xff] }
   0xd   :  { %1169 = vmatprep.mubr.msk.f32.mxu0 %vm68_vm1, %v30_v10  ;;  %1214 = vmatpush3.msra.mxu1 %v440_v15  ;;  %v38_v34 = vld [vmem:[%s1867_s0 + $0x60] sm:$0xff]  ;;  %v433_v36 = vld [vmem:[%s1868_s3 + $0x38] sm:$0xff]  ;;  %v432_v39 = vld [vmem:[%s1868_s3 + $0x30] sm:$0xff] }
   0xe   :  { %1191 = vmatmul.mubr.msk.f32.gmra.mxu1 %vm68_vm1, %v45_v11  ;;  %1215 = vmatprep.subr.mxu1 %v439_v18  ;;  %v54_v37 = vld [vmem:[%s1867_s0 + $0xe0] sm:$0xff]  ;;  %v40_v40 = vld [vmem:[%s1867_s0 + $0x70] sm:$0xff]  ;;  %v55_v41 = vld [vmem:[%s1867_s0 + $0xe8] sm:$0xff] }
   0xf   :  { %1193 = vmatprep.mubr.msk.f32.mxu1 %vm68_vm1, %v46_v12  ;;  %1216 = vmatpush3.msra.mxu1 %v439_v18  ;;  %v431_v42 = vld [vmem:[%s1868_s3 + $0x28] sm:$0xff]  ;;  %v56_v43 = vld [vmem:[%s1867_s0 + $0xf0] sm:$0xff]  ;;  %v41_v44 = vld [vmem:[%s1867_s0 + $0x78] sm:$0xff] }
  0x10   :  { %1170 = vmatmul.mubr.msk.f32.gmra.mxu0 %vm68_vm1, %v31_v14  ;;  %1217 = vmatprep.subr.mxu1 %v438_v21  ;;  %v430_v45 = vld [vmem:[%s1868_s3 + $0x20] sm:$0xff]  ;;  %v57_v46 = vld [vmem:[%s1867_s0 + $0xf8] sm:$0xff]  ;;  %v428_v48 = vld [vmem:[%s1868_s3 + $0x10] sm:$0xff] }
  0x11   :  { %1172 = vmatprep.mubr.msk.f32.mxu0 %vm68_vm1, %v32_v16  ;;  %1218 = vmatpush3.msra.mxu1 %v438_v21  ;;  %v429_v47 = vld [vmem:[%s1868_s3 + $0x18] sm:$0xff]  ;;  %v427_v49 = vld [vmem:[%s1868_s3 + $0x8] sm:$0xff]  ;;  %v426_v50 = vld [vmem:[%s1868_s3] sm:$0xff] }
  0x12   :  { %1194 = vmatmul.mubr.msk.f32.gmra.mxu1 %vm68_vm1, %v47_v17  ;;  %1219 = vmatprep.subr.mxu1 %v437_v24  ;;  %v721_v51 = vld [vmem:[%s1869_s5 + $0x78] sm:$0xff]  ;;  %v720_v52 = vld [vmem:[%s1869_s5 + $0x70] sm:$0xff]  ;;  %v719_v53 = vld [vmem:[%s1869_s5 + $0x68] sm:$0xff] }
  0x13   :  { %1196 = vmatprep.mubr.msk.f32.mxu1 %vm68_vm1, %v48_v19  ;;  %1220 = vmatpush3.msra.mxu1 %v437_v24  ;;  %v718_v54 = vld [vmem:[%s1869_s5 + $0x60] sm:$0xff]  ;;  %v717_v55 = vld [vmem:[%s1869_s5 + $0x58] sm:$0xff]  ;;  %v716_v56 = vld [vmem:[%s1869_s5 + $0x50] sm:$0xff] }
  0x14   :  { %1173 = vmatmul.mubr.msk.f32.gmra.mxu0 %vm68_vm1, %v33_v20  ;;  %1221 = vmatprep.subr.mxu1 %v436_v27  ;;  %v715_v57 = vld [vmem:[%s1869_s5 + $0x48] sm:$0xff]  ;;  %v714_v58 = vld [vmem:[%s1869_s5 + $0x40] sm:$0xff]  ;;  %v713_v59 = vld [vmem:[%s1869_s5 + $0x38] sm:$0xff] }
  0x15   :  { %1175 = vmatprep.mubr.msk.f32.mxu0 %vm68_vm1, %v34_v22  ;;  %1222 = vmatpush3.msra.mxu1 %v436_v27  ;;  %v712_v60 = vld [vmem:[%s1869_s5 + $0x30] sm:$0xff]  ;;  %v711_v61 = vld [vmem:[%s1869_s5 + $0x28] sm:$0xff]  ;;  %v710_v62 = vld [vmem:[%s1869_s5 + $0x20] sm:$0xff] }
  0x16   :  { %1197 = vmatmul.mubr.msk.f32.gmra.mxu1 %vm68_vm1, %v49_v23  ;;  %1223 = vmatprep.subr.mxu1 %v435_v30  ;;  %v709_v63 = vld [vmem:[%s1869_s5 + $0x18] sm:$0xff]  ;;  %v1644_v0 = vld [vmem:[%s1870_s2] ss:$0 sm:$0xff] }
  0x17   :  { %1199 = vmatprep.mubr.msk.f32.mxu1 %vm68_vm1, %v50_v25  ;;  %1224 = vmatpush3.msra.mxu1 %v435_v30 }
  0x18   :  { %1176 = vmatmul.mubr.msk.f32.gmra.mxu0 %vm68_vm1, %v35_v26  ;;  %1225 = vmatprep.subr.mxu1 %v434_v33 }
  0x19   :  { %1178 = vmatprep.mubr.msk.f32.mxu0 %vm68_vm1, %v36_v28  ;;  %1226 = vmatpush3.msra.mxu1 %v434_v33 }
  0x1a   :  { %1200 = vmatmul.mubr.msk.f32.gmra.mxu1 %vm68_vm1, %v51_v29  ;;  %1227 = vmatprep.subr.mxu1 %v433_v36 }
  0x1b   :  { %1202 = vmatprep.mubr.msk.f32.mxu1 %vm68_vm1, %v52_v31  ;;  %1228 = vmatpush3.msra.mxu1 %v433_v36 }
  0x1c   :  { %1179 = vmatmul.mubr.msk.f32.gmra.mxu0 %vm68_vm1, %v37_v32  ;;  %1229 = vmatprep.subr.mxu1 %v432_v39 }
  0x1d   :  { %1181 = vmatprep.mubr.msk.f32.mxu0 %vm68_vm1, %v38_v34  ;;  %1230 = vmatpush3.msra.mxu1 %v432_v39 }
  0x1e   :  { %1203 = vmatmul.mubr.msk.f32.gmra.mxu1 %vm68_vm1, %v53_v35  ;;  %1231 = vmatprep.subr.mxu1 %v431_v42 }
  0x1f   :  { %1205 = vmatprep.mubr.msk.f32.mxu1 %vm68_vm1, %v54_v37  ;;  %1232 = vmatpush3.msra.mxu1 %v431_v42 }
  0x20   :  { %1182 = vmatmul.mubr.msk.f32.gmra.mxu0 %vm68_vm1, %v39_v38  ;;  %1233 = vmatprep.subr.mxu1 %v430_v45 }
  0x21   :  { %1184 = vmatprep.mubr.msk.f32.mxu0 %vm68_vm1, %v40_v40  ;;  %1234 = vmatpush3.msra.mxu1 %v430_v45 }
  0x22   :  { %1206 = vmatmul.mubr.msk.f32.gmra.mxu1 %vm68_vm1, %v55_v41  ;;  %1235 = vmatprep.subr.mxu1 %v429_v47 }
  0x23   :  { %1208 = vmatprep.mubr.msk.f32.mxu1 %vm68_vm1, %v56_v43  ;;  %1236 = vmatpush3.msra.mxu1 %v429_v47 }
  0x24   :  { %1185 = vmatmul.mubr.msk.f32.gmra.mxu0 %vm68_vm1, %v41_v44  ;;  %1237 = vmatprep.subr.mxu1 %v428_v48 }
  0x25   :  { %1238 = vmatpush3.msra.mxu1 %v428_v48  ;;  %1291 = vmatprep.subr.mxu0 %v721_v51 }
  0x26   :  { %1209 = vmatmul.mubr.msk.f32.gmra.mxu1 %vm68_vm1, %v57_v46  ;;  %1239 = vmatprep.subr.mxu1 %v427_v49 }
  0x27   :  { %1240 = vmatpush3.msra.mxu1 %v427_v49  ;;  %1292 = vmatpush3.msra.mxu0 %v721_v51 }
  0x28   :  { %1241 = vmatprep.subr.mxu1 %v426_v50  ;;  %1293 = vmatprep.subr.mxu0 %v720_v52 }
  0x29   :  { %1242 = vmatpush3.msra.mxu1 %v426_v50  ;;  %1294 = vmatpush3.msra.mxu0 %v720_v52 }
  0x2a   :  { %1295 = vmatprep.subr.mxu0 %v719_v53 }
  0x2b   :  { %1296 = vmatpush3.msra.mxu0 %v719_v53 }
  0x2c   :  { %1297 = vmatprep.subr.mxu0 %v718_v54 }
  0x2d   :  { %1298 = vmatpush3.msra.mxu0 %v718_v54 }
  0x2e   :  { %1299 = vmatprep.subr.mxu0 %v717_v55 }
  0x2f   :  { %1300 = vmatpush3.msra.mxu0 %v717_v55 }
  0x30   :  { %1301 = vmatprep.subr.mxu0 %v716_v56 }
  0x31   :  { %1302 = vmatpush3.msra.mxu0 %v716_v56 }
  0x32   :  { %1303 = vmatprep.subr.mxu0 %v715_v57 }
  0x33   :  { %1304 = vmatpush3.msra.mxu0 %v715_v57 }
  0x34   :  { %1305 = vmatprep.subr.mxu0 %v714_v58 }
  0x35   :  { %1306 = vmatpush3.msra.mxu0 %v714_v58 }
  0x36   :  { %1307 = vmatprep.subr.mxu0 %v713_v59 }
  0x37   :  { %1308 = vmatpush3.msra.mxu0 %v713_v59 }
  0x38   :  { %1309 = vmatprep.subr.mxu0 %v712_v60 }
  0x39   :  { %1310 = vmatpush3.msra.mxu0 %v712_v60 }
  0x3a   :  { %1311 = vmatprep.subr.mxu0 %v711_v61 }
  0x3b   :  { %1312 = vmatpush3.msra.mxu0 %v711_v61 }
  0x3c   :  { %1313 = vmatprep.subr.mxu0 %v710_v62 }
  0x3d   :  { %1314 = vmatpush3.msra.mxu0 %v710_v62 }
  0x3e   :  { %1315 = vmatprep.subr.mxu0 %v709_v63 }
  0x3f   :  { %1316 = vmatpush3.msra.mxu0 %v709_v63 }
  0xc8   :  { %v1165_v1 = vpop.f32.mrf.mxu0 }
  0xc9   :  { %v241_v2 = vadd.f32 %v1165_v1, %v1644_v0 }
  0xca   :  { %v235_v3 = vpop.f32.mrf.mxu0  ;;  %v1647_v4 = vpop.f32.mrf.mxu1 }
  0xcb   :  { %v236_v5 = vadd.f32 %v1644_v0, %v235_v3  ;;  %v395_v9 = vmax.f32 %v241_v2, 0.0  ;;  %v321_v62 = vadd.f32 %v1647_v4, %v1644_v0 }
  0xcc   :  { %v1168_v6 = vpop.f32.mrf.mxu0  ;;  %v315_v7 = vpop.f32.mrf.mxu1 }
  0xcd   :  { %v394_v8 = vmax.f32 %v236_v5, 0.0  ;;  %v251_v10 = vadd.f32 %v1168_v6, %v1644_v0  ;;  %v316_v52 = vadd.f32 %v1644_v0, %v315_v7  ;;  %v411_v3 = vmax.f32 %v321_v62, 0.0 }
  0xce   :  { %v245_v11 = vpop.f32.mrf.mxu0  ;;  %v1651_v12 = vpop.f32.mrf.mxu1 }
  0xcf   :  { %v246_v13 = vadd.f32 %v1644_v0, %v245_v11  ;;  %1243 = vmatprep.mubr.f32.mxu1 %v394_v8  ;;  %v397_v17 = vmax.f32 %v251_v10, 0.0  ;;  %v410_v59 = vmax.f32 %v316_v52, 0.0  ;;  %v331_v5 = vadd.f32 %v1651_v12, %v1644_v0 }
  0xd0   :  { %v1171_v14 = vpop.f32.mrf.mxu0  ;;  %1244 = vmatmul.mubr.f32.vlgmr.msra.gmra.mxu1 %v395_v9  ;;  %v325_v15 = vpop.f32.mrf.mxu1 }
  0xd1   :  { %v396_v16 = vmax.f32 %v246_v13, 0.0  ;;  %v261_v18 = vadd.f32 %v1171_v14, %v1644_v0  ;;  %v326_v60 = vadd.f32 %v1644_v0, %v325_v15  ;;  %v413_v9 = vmax.f32 %v331_v5, 0.0 }
  0xd2   :  { %v255_v19 = vpop.f32.mrf.mxu0  ;;  %v1655_v20 = vpop.f32.mrf.mxu1 }
  0xd3   :  { %v256_v21 = vadd.f32 %v1644_v0, %v255_v19  ;;  %1246 = vmatprep.mubr.f32.mxu1 %v396_v16  ;;  %v399_v24 = vmax.f32 %v261_v18, 0.0  ;;  %v412_v1 = vmax.f32 %v326_v60, 0.0  ;;  %v341_v4 = vadd.f32 %v1655_v20, %v1644_v0 }
  0xd4   :  { %v1174_v22 = vpop.f32.mrf.mxu0  ;;  %1247 = vmatmul.mubr.f32.gmra.mxu1 %v397_v17  ;;  %v335_v27 = vpop.f32.mrf.mxu1 }
  0xd5   :  { %v398_v23 = vmax.f32 %v256_v21, 0.0  ;;  %v271_v25 = vadd.f32 %v1174_v22, %v1644_v0  ;;  %v336_v2 = vadd.f32 %v1644_v0, %v335_v27  ;;  %v415_v14 = vmax.f32 %v341_v4, 0.0 }
  0xd6   :  { %v265_v26 = vpop.f32.mrf.mxu0  ;;  %v1198_v34 = vpop.f32.mrf.mxu1 }
  0xd7   :  { %v266_v28 = vadd.f32 %v1644_v0, %v265_v26  ;;  %1249 = vmatprep.mubr.f32.mxu1 %v398_v23  ;;  %v401_v31 = vmax.f32 %v271_v25, 0.0  ;;  %v414_v7 = vmax.f32 %v336_v2, 0.0  ;;  %v351_v15 = vadd.f32 %v1198_v34, %v1644_v0  ;;  %v708_v34 = vld [vmem:[%s1869_s5 + $0x10] sm:$0xff] }
  0xd8   :  { %v1177_v29 = vpop.f32.mrf.mxu0  ;;  %1250 = vmatmul.mubr.f32.gmra.mxu1 %v399_v24  ;;  %v345_v41 = vpop.f32.mrf.mxu1  ;;  %1317 = vmatprep.subr.mxu0 %v708_v34 }
  0xd9   :  { %v400_v30 = vmax.f32 %v266_v28, 0.0  ;;  %v281_v32 = vadd.f32 %v1177_v29, %v1644_v0  ;;  %v346_v8 = vadd.f32 %v1644_v0, %v345_v41  ;;  %v417_v18 = vmax.f32 %v351_v15, 0.0  ;;  %1318 = vmatpush3.msra.mxu0 %v708_v34 }
  0xda   :  { %v275_v33 = vpop.f32.mrf.mxu0  ;;  %v1201_v48 = vpop.f32.mrf.mxu1 }
  0xdb   :  { %v276_v35 = vadd.f32 %v1644_v0, %v275_v33  ;;  %1252 = vmatprep.mubr.f32.mxu1 %v400_v30  ;;  %v403_v38 = vmax.f32 %v281_v32, 0.0  ;;  %v416_v11 = vmax.f32 %v346_v8, 0.0  ;;  %v361_v19 = vadd.f32 %v1201_v48, %v1644_v0 }
  0xdc   :  { %v1180_v36 = vpop.f32.mrf.mxu0  ;;  %1253 = vmatmul.mubr.f32.gmra.mxu1 %v401_v31  ;;  %v355_v56 = vpop.f32.mrf.mxu1 }
  0xdd   :  { %v402_v37 = vmax.f32 %v276_v35, 0.0  ;;  %v291_v39 = vadd.f32 %v1180_v36, %v1644_v0  ;;  %v356_v13 = vadd.f32 %v1644_v0, %v355_v56  ;;  %v419_v23 = vmax.f32 %v361_v19, 0.0  ;;  %v707_v35 = vld [vmem:[%s1869_s5 + $0x8] sm:$0xff]  ;;  %v1699_v36 = vld [vmem:[%s1871_s4] ss:$0 sm:$0xff] }
  0xde   :  { %v285_v40 = vpop.f32.mrf.mxu0  ;;  %v1204_v63 = vpop.f32.mrf.mxu1  ;;  %1319 = vmatprep.subr.mxu0 %v707_v35 }
  0xdf   :  { %v286_v42 = vadd.f32 %v1644_v0, %v285_v40  ;;  %1255 = vmatprep.mubr.f32.mxu1 %v402_v37  ;;  %v405_v45 = vmax.f32 %v291_v39, 0.0  ;;  %v418_v16 = vmax.f32 %v356_v13, 0.0  ;;  %v371_v24 = vadd.f32 %v1204_v63, %v1644_v0  ;;  %1320 = vmatpush3.msra.mxu0 %v707_v35 }
  0xe0   :  { %v1183_v43 = vpop.f32.mrf.mxu0  ;;  %1256 = vmatmul.mubr.f32.gmra.mxu1 %v403_v38  ;;  %v365_v6 = vpop.f32.mrf.mxu1 }
  0xe1   :  { %v404_v44 = vmax.f32 %v286_v42, 0.0  ;;  %v301_v46 = vadd.f32 %v1183_v43, %v1644_v0  ;;  %v366_v17 = vadd.f32 %v1644_v0, %v365_v6  ;;  %v421_v28 = vmax.f32 %v371_v24, 0.0 }
  0xe2   :  { %v295_v47 = vpop.f32.mrf.mxu0  ;;  %v1207_v10 = vpop.f32.mrf.mxu1 }
  0xe3   :  { %v296_v49 = vadd.f32 %v1644_v0, %v295_v47  ;;  %1258 = vmatprep.mubr.f32.mxu1 %v404_v44  ;;  %v407_v53 = vmax.f32 %v301_v46, 0.0  ;;  %v420_v20 = vmax.f32 %v366_v17, 0.0  ;;  %v381_v29 = vadd.f32 %v1207_v10, %v1644_v0 }
  0xe4   :  { %v1186_v50 = vpop.f32.mrf.mxu0  ;;  %1259 = vmatmul.mubr.f32.gmra.mxu1 %v405_v45  ;;  %v375_v12 = vpop.f32.mrf.mxu1 }
  0xe5   :  { %v406_v51 = vmax.f32 %v296_v49, 0.0  ;;  %v311_v54 = vadd.f32 %v1186_v50, %v1644_v0  ;;  %v376_v22 = vadd.f32 %v1644_v0, %v375_v12  ;;  %v423_v31 = vmax.f32 %v381_v29, 0.0 }
  0xe6   :  { %v305_v55 = vpop.f32.mrf.mxu0  ;;  %v1210_v21 = vpop.f32.mrf.mxu1 }
  0xe7   :  { %v306_v57 = vadd.f32 %v1644_v0, %v305_v55  ;;  %1261 = vmatprep.mubr.f32.mxu1 %v406_v51  ;;  %v409_v61 = vmax.f32 %v311_v54, 0.0  ;;  %v422_v26 = vmax.f32 %v376_v22, 0.0  ;;  %v391_v32 = vadd.f32 %v1210_v21, %v1644_v0 }
  0xe8   :  { %1262 = vmatmul.mubr.f32.gmra.mxu1 %v407_v53  ;;  %v385_v25 = vpop.f32.mrf.mxu1 }
  0xe9   :  { %v408_v58 = vmax.f32 %v306_v57, 0.0  ;;  %v386_v27 = vadd.f32 %v1644_v0, %v385_v25  ;;  %v425_v33 = vmax.f32 %v391_v32, 0.0  ;;  %v706_v0 = vld [vmem:[%s1869_s5] sm:$0xff] }
  0xea   :  { %1321 = vmatprep.subr.mxu0 %v706_v0 }
  0xeb   :  { %1264 = vmatprep.mubr.f32.mxu1 %v408_v58  ;;  %v424_v30 = vmax.f32 %v386_v27, 0.0  ;;  %1322 = vmatpush3.msra.mxu0 %v706_v0 }
  0xec   :  { %1265 = vmatmul.mubr.f32.gmra.mxu1 %v409_v61 }
  0xed   :  { %1267 = vmatprep.mubr.f32.mxu1 %v410_v59 }
  0xf0   :  { %1268 = vmatmul.mubr.f32.gmra.mxu1 %v411_v3 }
  0xf1   :  { %1270 = vmatprep.mubr.f32.mxu1 %v412_v1 }
  0xf4   :  { %1271 = vmatmul.mubr.f32.gmra.mxu1 %v413_v9 }
  0xf5   :  { %1273 = vmatprep.mubr.f32.mxu1 %v414_v7 }
  0xf8   :  { %1274 = vmatmul.mubr.f32.gmra.mxu1 %v415_v14 }
  0xf9   :  { %1276 = vmatprep.mubr.f32.mxu1 %v416_v11 }
  0xfc   :  { %1277 = vmatmul.mubr.f32.gmra.mxu1 %v417_v18 }
  0xfd   :  { %1279 = vmatprep.mubr.f32.mxu1 %v418_v16 }
 0x100   :  { %1280 = vmatmul.mubr.f32.gmra.mxu1 %v419_v23 }
 0x101   :  { %1282 = vmatprep.mubr.f32.mxu1 %v420_v20 }
 0x104   :  { %1283 = vmatmul.mubr.f32.gmra.mxu1 %v421_v28 }
 0x105   :  { %1285 = vmatprep.mubr.f32.mxu1 %v422_v26 }
 0x108   :  { %1286 = vmatmul.mubr.f32.gmra.mxu1 %v423_v31 }
 0x109   :  { %1288 = vmatprep.mubr.f32.mxu1 %v424_v30 }
 0x10c   :  { %1289 = vmatmul.mubr.f32.gmra.mxu1 %v425_v33 }
 0x190   :  { %v1245_v37 = vpop.f32.mrf.mxu1 }
 0x191   :  { %v521_v38 = vadd.f32 %v1245_v37, %v1699_v36 }
 0x192   :  { %v515_v39 = vpop.f32.mrf.mxu1 }
 0x193   :  { %v516_v40 = vadd.f32 %v1699_v36, %v515_v39  ;;  %v675_v43 = vmax.f32 %v521_v38, 0.0 }
 0x194   :  { %v1248_v41 = vpop.f32.mrf.mxu1 }
 0x195   :  { %v674_v42 = vmax.f32 %v516_v40, 0.0  ;;  %v531_v44 = vadd.f32 %v1248_v41, %v1699_v36 }
 0x196   :  { %v525_v45 = vpop.f32.mrf.mxu1 }
 0x197   :  { %v526_v46 = vadd.f32 %v1699_v36, %v525_v45  ;;  %1323 = vmatprep.mubr.f32.mxu0 %v674_v42  ;;  %v677_v49 = vmax.f32 %v531_v44, 0.0 }
 0x198   :  { %v1251_v47 = vpop.f32.mrf.mxu1  ;;  %1324 = vmatmul.mubr.f32.vlgmr.msra.gmra.mxu0 %v675_v43 }
 0x199   :  { %v676_v48 = vmax.f32 %v526_v46, 0.0  ;;  %v541_v50 = vadd.f32 %v1251_v47, %v1699_v36 }
 0x19a   :  { %v535_v51 = vpop.f32.mrf.mxu1 }
 0x19b   :  { %v536_v52 = vadd.f32 %v1699_v36, %v535_v51  ;;  %1326 = vmatprep.mubr.f32.mxu0 %v676_v48  ;;  %v679_v55 = vmax.f32 %v541_v50, 0.0 }
 0x19c   :  { %v1254_v53 = vpop.f32.mrf.mxu1  ;;  %1327 = vmatmul.mubr.f32.gmra.mxu0 %v677_v49 }
 0x19d   :  { %v678_v54 = vmax.f32 %v536_v52, 0.0  ;;  %v551_v56 = vadd.f32 %v1254_v53, %v1699_v36 }
 0x19e   :  { %v545_v57 = vpop.f32.mrf.mxu1 }
 0x19f   :  { %v546_v58 = vadd.f32 %v1699_v36, %v545_v57  ;;  %1329 = vmatprep.mubr.f32.mxu0 %v678_v54  ;;  %v681_v61 = vmax.f32 %v551_v56, 0.0 }
 0x1a0   :  { %v1257_v59 = vpop.f32.mrf.mxu1  ;;  %1330 = vmatmul.mubr.f32.gmra.mxu0 %v679_v55 }
 0x1a1   :  { %v680_v60 = vmax.f32 %v546_v58, 0.0  ;;  %v561_v62 = vadd.f32 %v1257_v59, %v1699_v36 }
 0x1a2   :  { %v555_v63 = vpop.f32.mrf.mxu1 }
 0x1a3   :  { %v556_v1 = vadd.f32 %v1699_v36, %v555_v63  ;;  %1332 = vmatprep.mubr.f32.mxu0 %v680_v60  ;;  %v683_v5 = vmax.f32 %v561_v62, 0.0 }
 0x1a4   :  { %v1260_v2 = vpop.f32.mrf.mxu1  ;;  %1333 = vmatmul.mubr.f32.gmra.mxu0 %v681_v61 }
 0x1a5   :  { %v682_v3 = vmax.f32 %v556_v1, 0.0  ;;  %v571_v6 = vadd.f32 %v1260_v2, %v1699_v36 }
 0x1a6   :  { %v565_v7 = vpop.f32.mrf.mxu1 }
 0x1a7   :  { %v566_v8 = vadd.f32 %v1699_v36, %v565_v7  ;;  %1335 = vmatprep.mubr.f32.mxu0 %v682_v3  ;;  %v685_v10 = vmax.f32 %v571_v6, 0.0 }
 0x1a8   :  { %v1263_v9 = vpop.f32.mrf.mxu1  ;;  %1336 = vmatmul.mubr.f32.gmra.mxu0 %v683_v5 }
 0x1a9   :  { %v684_v4 = vmax.f32 %v566_v8, 0.0  ;;  %v581_v11 = vadd.f32 %v1263_v9, %v1699_v36  ;;  %v1736_v8 = vld [vmem:[%s1872_s6] ss:$0 sm:$0xff] }
 0x1aa   :  { %v575_v13 = vpop.f32.mrf.mxu1 }
 0x1ab   :  { %v576_v14 = vadd.f32 %v1699_v36, %v575_v13  ;;  %1338 = vmatprep.mubr.f32.mxu0 %v684_v4  ;;  %v687_v16 = vmax.f32 %v581_v11, 0.0 }
 0x1ac   :  { %v1266_v15 = vpop.f32.mrf.mxu1  ;;  %1339 = vmatmul.mubr.f32.gmra.mxu0 %v685_v10 }
 0x1ad   :  { %v686_v12 = vmax.f32 %v576_v14, 0.0  ;;  %v591_v17 = vadd.f32 %v1266_v15, %v1699_v36 }
 0x1ae   :  { %v585_v18 = vpop.f32.mrf.mxu1 }
 0x1af   :  { %v586_v19 = vadd.f32 %v1699_v36, %v585_v18  ;;  %1341 = vmatprep.mubr.f32.mxu0 %v686_v12  ;;  %v689_v22 = vmax.f32 %v591_v17, 0.0 }
 0x1b0   :  { %v1269_v21 = vpop.f32.mrf.mxu1  ;;  %1342 = vmatmul.mubr.f32.gmra.mxu0 %v687_v16 }
 0x1b1   :  { %v688_v20 = vmax.f32 %v586_v19, 0.0  ;;  %v601_v23 = vadd.f32 %v1269_v21, %v1699_v36 }
 0x1b2   :  { %v595_v24 = vpop.f32.mrf.mxu1 }
 0x1b3   :  { %v596_v25 = vadd.f32 %v1699_v36, %v595_v24  ;;  %1344 = vmatprep.mubr.f32.mxu0 %v688_v20  ;;  %v691_v28 = vmax.f32 %v601_v23, 0.0 }
 0x1b4   :  { %v1272_v26 = vpop.f32.mrf.mxu1  ;;  %1345 = vmatmul.mubr.f32.gmra.mxu0 %v689_v22 }
 0x1b5   :  { %v690_v27 = vmax.f32 %v596_v25, 0.0  ;;  %v611_v29 = vadd.f32 %v1272_v26, %v1699_v36 }
 0x1b6   :  { %v605_v30 = vpop.f32.mrf.mxu1 }
 0x1b7   :  { %v606_v31 = vadd.f32 %v1699_v36, %v605_v30  ;;  %1347 = vmatprep.mubr.f32.mxu0 %v690_v27  ;;  %v693_v34 = vmax.f32 %v611_v29, 0.0 }
 0x1b8   :  { %v1275_v32 = vpop.f32.mrf.mxu1  ;;  %1348 = vmatmul.mubr.f32.gmra.mxu0 %v691_v28 }
 0x1b9   :  { %v692_v33 = vmax.f32 %v606_v31, 0.0  ;;  %v621_v35 = vadd.f32 %v1275_v32, %v1699_v36 }
 0x1ba   :  { %v615_v0 = vpop.f32.mrf.mxu1 }
 0x1bb   :  { %v616_v37 = vadd.f32 %v1699_v36, %v615_v0  ;;  %1350 = vmatprep.mubr.f32.mxu0 %v692_v33  ;;  %v695_v40 = vmax.f32 %v621_v35, 0.0 }
 0x1bc   :  { %v1278_v38 = vpop.f32.mrf.mxu1  ;;  %1351 = vmatmul.mubr.f32.gmra.mxu0 %v693_v34 }
 0x1bd   :  { %v694_v39 = vmax.f32 %v616_v37, 0.0  ;;  %v631_v41 = vadd.f32 %v1278_v38, %v1699_v36 }
 0x1be   :  { %v625_v42 = vpop.f32.mrf.mxu1 }
 0x1bf   :  { %v626_v43 = vadd.f32 %v1699_v36, %v625_v42  ;;  %1353 = vmatprep.mubr.f32.mxu0 %v694_v39  ;;  %v697_v46 = vmax.f32 %v631_v41, 0.0 }
 0x1c0   :  { %v1281_v44 = vpop.f32.mrf.mxu1  ;;  %1354 = vmatmul.mubr.f32.gmra.mxu0 %v695_v40 }
 0x1c1   :  { %v696_v45 = vmax.f32 %v626_v43, 0.0  ;;  %v641_v47 = vadd.f32 %v1281_v44, %v1699_v36 }
 0x1c2   :  { %v635_v48 = vpop.f32.mrf.mxu1 }
 0x1c3   :  { %v636_v49 = vadd.f32 %v1699_v36, %v635_v48  ;;  %1356 = vmatprep.mubr.f32.mxu0 %v696_v45  ;;  %v699_v52 = vmax.f32 %v641_v47, 0.0 }
 0x1c4   :  { %v1284_v50 = vpop.f32.mrf.mxu1  ;;  %1357 = vmatmul.mubr.f32.gmra.mxu0 %v697_v46 }
 0x1c5   :  { %v698_v51 = vmax.f32 %v636_v49, 0.0  ;;  %v651_v53 = vadd.f32 %v1284_v50, %v1699_v36 }
 0x1c6   :  { %v645_v54 = vpop.f32.mrf.mxu1 }
 0x1c7   :  { %v646_v55 = vadd.f32 %v1699_v36, %v645_v54  ;;  %1359 = vmatprep.mubr.f32.mxu0 %v698_v51  ;;  %v701_v58 = vmax.f32 %v651_v53, 0.0 }
 0x1c8   :  { %v1287_v56 = vpop.f32.mrf.mxu1  ;;  %1360 = vmatmul.mubr.f32.gmra.mxu0 %v699_v52 }
 0x1c9   :  { %v700_v57 = vmax.f32 %v646_v55, 0.0  ;;  %v661_v59 = vadd.f32 %v1287_v56, %v1699_v36 }
 0x1ca   :  { %v655_v60 = vpop.f32.mrf.mxu1 }
 0x1cb   :  { %v656_v61 = vadd.f32 %v1699_v36, %v655_v60  ;;  %1362 = vmatprep.mubr.f32.mxu0 %v700_v57  ;;  %v703_v1 = vmax.f32 %v661_v59, 0.0 }
 0x1cc   :  { %v1290_v62 = vpop.f32.mrf.mxu1  ;;  %1363 = vmatmul.mubr.f32.gmra.mxu0 %v701_v58 }
 0x1cd   :  { %v702_v63 = vmax.f32 %v656_v61, 0.0  ;;  %v671_v2 = vadd.f32 %v1290_v62, %v1699_v36 }
 0x1ce   :  { %v665_v3 = vpop.f32.mrf.mxu1 }
 0x1cf   :  { %v666_v5 = vadd.f32 %v1699_v36, %v665_v3  ;;  %1365 = vmatprep.mubr.f32.mxu0 %v702_v63  ;;  %v705_v7 = vmax.f32 %v671_v2, 0.0 }
 0x1d0   :  { %1366 = vmatmul.mubr.f32.gmra.mxu0 %v703_v1 }
 0x1d1   :  { %v704_v6 = vmax.f32 %v666_v5, 0.0 }
 0x1d3   :  { %1368 = vmatprep.mubr.f32.mxu0 %v704_v6 }
 0x1d4   :  { %1369 = vmatmul.mubr.f32.gmra.mxu0 %v705_v7 }
 0x258   :  { %v1325_v9 = vpop.f32.mrf.mxu0 }
 0x259   :  { %v801_v4 = vadd.f32 %v1325_v9, %v1736_v8 }
 0x25a   :  { %v795_v10 = vpop.f32.mrf.mxu0 }
 0x25b   :  { %955 = vst [vmem:[%s1873_s7 + $0x8] sm:$0xff] %v801_v4  ;;  %v796_v36 = vadd.f32 %v1736_v8, %v795_v10 }
 0x25c   :  { %v1328_v11 = vpop.f32.mrf.mxu0 }
 0x25d   :  { %954 = vst [vmem:[%s1873_s7] sm:$0xff] %v796_v36  ;;  %v811_v13 = vadd.f32 %v1328_v11, %v1736_v8 }
 0x25e   :  { %v805_v14 = vpop.f32.mrf.mxu0 }
 0x25f   :  { %957 = vst [vmem:[%s1873_s7 + $0x18] sm:$0xff] %v811_v13  ;;  %v806_v15 = vadd.f32 %v1736_v8, %v805_v14 }
 0x260   :  { %v1331_v12 = vpop.f32.mrf.mxu0 }
 0x261   :  { %956 = vst [vmem:[%s1873_s7 + $0x10] sm:$0xff] %v806_v15  ;;  %v821_v16 = vadd.f32 %v1331_v12, %v1736_v8 }
 0x262   :  { %v815_v17 = vpop.f32.mrf.mxu0 }
 0x263   :  { %959 = vst [vmem:[%s1873_s7 + $0x28] sm:$0xff] %v821_v16  ;;  %v816_v18 = vadd.f32 %v1736_v8, %v815_v17 }
 0x264   :  { %v1334_v19 = vpop.f32.mrf.mxu0 }
 0x265   :  { %958 = vst [vmem:[%s1873_s7 + $0x20] sm:$0xff] %v816_v18  ;;  %v831_v21 = vadd.f32 %v1334_v19, %v1736_v8 }
 0x266   :  { %v825_v20 = vpop.f32.mrf.mxu0 }
 0x267   :  { %961 = vst [vmem:[%s1873_s7 + $0x38] sm:$0xff] %v831_v21  ;;  %v826_v22 = vadd.f32 %v1736_v8, %v825_v20 }
 0x268   :  { %v1337_v23 = vpop.f32.mrf.mxu0 }
 0x269   :  { %960 = vst [vmem:[%s1873_s7 + $0x30] sm:$0xff] %v826_v22  ;;  %v841_v24 = vadd.f32 %v1337_v23, %v1736_v8 }
 0x26a   :  { %v835_v25 = vpop.f32.mrf.mxu0 }
 0x26b   :  { %963 = vst [vmem:[%s1873_s7 + $0x48] sm:$0xff] %v841_v24  ;;  %v836_v26 = vadd.f32 %v1736_v8, %v835_v25 }
 0x26c   :  { %v1340_v27 = vpop.f32.mrf.mxu0 }
 0x26d   :  { %962 = vst [vmem:[%s1873_s7 + $0x40] sm:$0xff] %v836_v26  ;;  %v851_v28 = vadd.f32 %v1340_v27, %v1736_v8 }
 0x26e   :  { %v845_v29 = vpop.f32.mrf.mxu0 }
 0x26f   :  { %965 = vst [vmem:[%s1873_s7 + $0x58] sm:$0xff] %v851_v28  ;;  %v846_v30 = vadd.f32 %v1736_v8, %v845_v29 }
 0x270   :  { %v1343_v31 = vpop.f32.mrf.mxu0 }
 0x271   :  { %964 = vst [vmem:[%s1873_s7 + $0x50] sm:$0xff] %v846_v30  ;;  %v861_v32 = vadd.f32 %v1343_v31, %v1736_v8 }
 0x272   :  { %v855_v33 = vpop.f32.mrf.mxu0 }
 0x273   :  { %967 = vst [vmem:[%s1873_s7 + $0x68] sm:$0xff] %v861_v32  ;;  %v856_v34 = vadd.f32 %v1736_v8, %v855_v33 }
 0x274   :  { %v1346_v35 = vpop.f32.mrf.mxu0 }
 0x275   :  { %966 = vst [vmem:[%s1873_s7 + $0x60] sm:$0xff] %v856_v34  ;;  %v871_v0 = vadd.f32 %v1346_v35, %v1736_v8 }
 0x276   :  { %v865_v37 = vpop.f32.mrf.mxu0 }
 0x277   :  { %969 = vst [vmem:[%s1873_s7 + $0x78] sm:$0xff] %v871_v0  ;;  %v866_v38 = vadd.f32 %v1736_v8, %v865_v37 }
 0x278   :  { %v1349_v39 = vpop.f32.mrf.mxu0 }
 0x279   :  { %968 = vst [vmem:[%s1873_s7 + $0x70] sm:$0xff] %v866_v38  ;;  %v881_v40 = vadd.f32 %v1349_v39, %v1736_v8 }
 0x27a   :  { %v875_v41 = vpop.f32.mrf.mxu0 }
 0x27b   :  { %971 = vst [vmem:[%s1873_s7 + $0x88] sm:$0xff] %v881_v40  ;;  %v876_v42 = vadd.f32 %v1736_v8, %v875_v41 }
 0x27c   :  { %v1352_v43 = vpop.f32.mrf.mxu0 }
 0x27d   :  { %970 = vst [vmem:[%s1873_s7 + $0x80] sm:$0xff] %v876_v42  ;;  %v891_v44 = vadd.f32 %v1352_v43, %v1736_v8 }
 0x27e   :  { %v885_v45 = vpop.f32.mrf.mxu0 }
 0x27f   :  { %973 = vst [vmem:[%s1873_s7 + $0x98] sm:$0xff] %v891_v44  ;;  %v886_v46 = vadd.f32 %v1736_v8, %v885_v45 }
 0x280   :  { %v1355_v47 = vpop.f32.mrf.mxu0 }
 0x281   :  { %972 = vst [vmem:[%s1873_s7 + $0x90] sm:$0xff] %v886_v46  ;;  %v901_v48 = vadd.f32 %v1355_v47, %v1736_v8 }
 0x282   :  { %v895_v49 = vpop.f32.mrf.mxu0 }
 0x283   :  { %975 = vst [vmem:[%s1873_s7 + $0xa8] sm:$0xff] %v901_v48  ;;  %v896_v50 = vadd.f32 %v1736_v8, %v895_v49 }
 0x284   :  { %v1358_v51 = vpop.f32.mrf.mxu0 }
 0x285   :  { %974 = vst [vmem:[%s1873_s7 + $0xa0] sm:$0xff] %v896_v50  ;;  %v911_v52 = vadd.f32 %v1358_v51, %v1736_v8 }
 0x286   :  { %v905_v53 = vpop.f32.mrf.mxu0 }
 0x287   :  { %977 = vst [vmem:[%s1873_s7 + $0xb8] sm:$0xff] %v911_v52  ;;  %v906_v54 = vadd.f32 %v1736_v8, %v905_v53 }
 0x288   :  { %v1361_v55 = vpop.f32.mrf.mxu0 }
 0x289   :  { %976 = vst [vmem:[%s1873_s7 + $0xb0] sm:$0xff] %v906_v54  ;;  %v921_v56 = vadd.f32 %v1361_v55, %v1736_v8 }
 0x28a   :  { %v915_v57 = vpop.f32.mrf.mxu0 }
 0x28b   :  { %979 = vst [vmem:[%s1873_s7 + $0xc8] sm:$0xff] %v921_v56  ;;  %v916_v58 = vadd.f32 %v1736_v8, %v915_v57 }
 0x28c   :  { %v1364_v59 = vpop.f32.mrf.mxu0 }
 0x28d   :  { %978 = vst [vmem:[%s1873_s7 + $0xc0] sm:$0xff] %v916_v58  ;;  %v931_v60 = vadd.f32 %v1364_v59, %v1736_v8 }
 0x28e   :  { %v925_v61 = vpop.f32.mrf.mxu0 }
 0x28f   :  { %981 = vst [vmem:[%s1873_s7 + $0xd8] sm:$0xff] %v931_v60  ;;  %v926_v62 = vadd.f32 %v1736_v8, %v925_v61 }
 0x290   :  { %v1367_v63 = vpop.f32.mrf.mxu0 }
 0x291   :  { %980 = vst [vmem:[%s1873_s7 + $0xd0] sm:$0xff] %v926_v62  ;;  %v941_v1 = vadd.f32 %v1367_v63, %v1736_v8 }
 0x292   :  { %v935_v2 = vpop.f32.mrf.mxu0 }
 0x293   :  { %983 = vst [vmem:[%s1873_s7 + $0xe8] sm:$0xff] %v941_v1  ;;  %v936_v3 = vadd.f32 %v1736_v8, %v935_v2 }
 0x294   :  { %v1370_v5 = vpop.f32.mrf.mxu0 }
 0x295   :  { %982 = vst [vmem:[%s1873_s7 + $0xe0] sm:$0xff] %v936_v3  ;;  %v951_v6 = vadd.f32 %v1370_v5, %v1736_v8 }
 0x296   :  { %v945_v7 = vpop.f32.mrf.mxu0 }
 0x297   :  { %985 = vst [vmem:[%s1873_s7 + $0xf8] sm:$0xff] %v951_v6  ;;  %v946_v9 = vadd.f32 %v1736_v8, %v945_v7 }
 0x299   :  { %984 = vst [vmem:[%s1873_s7 + $0xf0] sm:$0xff] %v946_v9 }

</bundles_post_ra>
